<compile_context>
chip_gen: v7x
topology: tpu7x:2x2x1
jax: 0.10.0
libtpu: 0.0.40
codegen_flags: <defaults>
</compile_context>

<pallas_src>
import functools

import jax
import jax.numpy as jnp
from jax.experimental import pallas as pl
from jax.experimental.pallas import tpu as pltpu


# ----------------------------------------------------------------------------
# Kernels
# ----------------------------------------------------------------------------

def _gru_kernel(x_ref, h_ref, w_ih_ref, w_hh_ref, b_ih_ref, b_hh_ref,
                h_f32_ref, h_bf16_ref):
    """One GRU step.  bf16 matmul operands, f32 accumulation and gate math."""
    x = x_ref[...]                                    # (B, E)  bf16
    h = h_ref[...]                                    # (B, H)  f32
    H = h.shape[-1]

    gi = jnp.dot(x, w_ih_ref[...],
                 preferred_element_type=jnp.float32) + b_ih_ref[...]
    gh = jnp.dot(h.astype(jnp.bfloat16), w_hh_ref[...],
                 preferred_element_type=jnp.float32) + b_hh_ref[...]

    # PyTorch nn.GRU gate order: reset, update, new.  H is a multiple of 128,
    # so these slices are lane-aligned.
    r = jax.nn.sigmoid(gi[:, 0 * H:1 * H] + gh[:, 0 * H:1 * H])
    z = jax.nn.sigmoid(gi[:, 1 * H:2 * H] + gh[:, 1 * H:2 * H])
    n = jnp.tanh(gi[:, 2 * H:3 * H] + r * gh[:, 2 * H:3 * H])
    h_new = (1.0 - z) * n + z * h                     # (B, H) f32

    h_f32_ref[...] = h_new                         # recurrent state stays f32
    h_bf16_ref[...] = h_new.astype(jnp.bfloat16)   # matmul operand for the projection


def _proj_kernel(h_ref, wq_ref, scale_ref, b_ref, pred_ref):
    """One vocab tile of the output projection (grid axis 0 walks vocab tiles).

    Independent per tile -> the grid axis is "parallel" (v7x megacore shards
    the dominant weight stream across both TensorCores).
    """
    w = wq_ref[0].astype(jnp.bfloat16)                         # (H, tv) dequant (unscaled)
    acc = jnp.dot(h_ref[...], w,
                  preferred_element_type=jnp.float32)          # (B, tv) f32
    # Per-column scale applied to the accumulator (cheap: B*tv, not H*tv).
    pred_ref[...] = acc * scale_ref[...] + b_ref[...]


# ----------------------------------------------------------------------------
# Sizing helpers (generation-aware, buffer-count-aware)
# ----------------------------------------------------------------------------

def _round_up(x, m):
    return ((x + m - 1) // m) * m


@functools.lru_cache(maxsize=None)
def _tpu_vmem_capacity_bytes():
    try:
        return int(pltpu.get_tpu_info().vmem_capacity_bytes)
    except Exception:
        return 64 << 20   # conservative default: v7x per-TensorCore VMEM


def _pick_vocab_tile(batch, H, V, vmem_bytes):
    """Largest lane-aligned vocab tile whose streamed working set fits VMEM."""
    # 128 MiB chips (v5e/v6e) afford very wide tiles; v7x (64 MiB) targets 4096.
    cap = 8192 if vmem_bytes >= (100 << 20) else 4096
    budget = int(vmem_bytes * 0.35)
    # Bytes per vocab column: double-buffered {int8 weight col, f32 scale,
    # f32 bias, f32 output col} + single-buffered bf16 dequant temp.
    per_col = 2 * (H * 1 + 4 + 4 + batch * 4) + 2 * H
    tv = (budget // per_col) // 128 * 128
    tv = max(128, min(tv, cap, _round_up(V, 128)))
    return tv


def _gru_vmem_limit(B, E, H, capacity):
    bf16, f32 = 2, 4
    need = ((E + H) * 3 * H) * bf16                 # GRU weights
    need += B * E * bf16 + B * H * f32              # x, h
    need += 2 * 3 * H * f32                         # biases
    need += B * H * (f32 + bf16)                    # outputs
    need += 8 * B * 3 * H * f32                     # gate intermediates
    return int(min(max(2 * need, 8 << 20), capacity * 3 // 4))


def _proj_vmem_limit(B, H, tv, capacity):
    need = 2 * (B * H * 2)                                       # resident h (2x buffered)
    need += 2 * (H * tv * 1 + tv * 4 + tv * 4 + B * tv * 4)      # streamed, 2x buffered
    need += H * tv * 2                                           # bf16 dequant temp
    return int(min(max(int(1.5 * need) + (4 << 20), 8 << 20), capacity * 3 // 4))


# ----------------------------------------------------------------------------
# Parameter construction / kernel-layout prep
# ----------------------------------------------------------------------------

def init_params(key, embedding_dim, hidden_dim, output_vocab_dim):
    """f32 parameters in natural PyTorch layout (gate order [r | z | n])."""
    E, H, V = embedding_dim, hidden_dim, output_vocab_dim
    ks = jax.random.split(key, 7)
    s = 1.0 / jnp.sqrt(H)
    u = lambda k, shape: jax.random.uniform(k, shape, jnp.float32, -s, s)
    return {
        "embedding": jax.random.normal(ks[0], (V, E), jnp.float32),
        "w_ih": u(ks[1], (3 * H, E)),
        "w_hh": u(ks[2], (3 * H, H)),
        "b_ih": u(ks[3], (3 * H,)),
        "b_hh": u(ks[4], (3 * H,)),
        "w_out": u(ks[5], (V, H)),
        "b_out": u(ks[6], (V,)),
    }


def prepare_decode_params(params, tv=None, batch_hint=8):
    """One-time re-layout for the decode kernels.

    - embedding / GRU weights cast to bf16 and pre-transposed.
    - w_out transposed, padded to a multiple of the vocab tile, quantized to
      int8 with per-column f32 scales, and stored tile-major (nT, H, tv) so
      each streamed block is one contiguous HBM slab.
    """
    E = params["w_ih"].shape[1]
    H = params["w_hh"].shape[1]
    V = params["w_out"].shape[0]
    assert E % 128 == 0 and H % 128 == 0, "E and H must be multiples of 128 (lane)"

    vmem_bytes = _tpu_vmem_capacity_bytes()
    if tv is None:
        tv = _pick_vocab_tile(batch_hint, H, V, vmem_bytes)
    assert tv % 128 == 0 and tv >= 128

    v_pad = _round_up(V, tv)
    n_tiles = v_pad // tv
    f32, bf16 = jnp.float32, jnp.bfloat16

    w_out_t = jnp.zeros((H, v_pad), f32).at[:, :V].set(params["w_out"].T)
    amax = jnp.max(jnp.abs(w_out_t), axis=0, keepdims=True)        # (1, v_pad)
    scale = jnp.maximum(amax, 1e-8) / 127.0
    w_out_q = jnp.clip(jnp.round(w_out_t / scale), -127, 127).astype(jnp.int8)
    w_out_q = w_out_q.reshape(H, n_tiles, tv).transpose(1, 0, 2)   # (nT, H, tv)
    b_out = jnp.zeros((1, v_pad), f32).at[0, :V].set(params["b_out"])

    return {
        "embedding": params["embedding"].astype(bf16),             # (V, E)
        "w_ih_t": params["w_ih"].T.astype(bf16),                   # (E, 3H)
        "w_hh_t": params["w_hh"].T.astype(bf16),                   # (H, 3H)
        "b_ih": params["b_ih"].reshape(1, 3 * H).astype(f32),
        "b_hh": params["b_hh"].reshape(1, 3 * H).astype(f32),
        "w_out_q": w_out_q,                                        # (nT, H, tv) int8
        "w_out_scale": scale,                                      # (1, v_pad) f32
        "b_out": b_out,                                            # (1, v_pad) f32
    }


# ----------------------------------------------------------------------------
# Forward
# ----------------------------------------------------------------------------

@functools.partial(jax.jit, static_argnames=("output_vocab_dim",))
def decoder_base_forward(inp, hidden, dparams, *, output_vocab_dim):
    """Matches DecoderBase.forward(inp, hidden) in eval mode.

    inp    : (B,) int32 token ids
    hidden : (1, B, H) f32   (num_layers == 1)
    returns (prediction (B, V) f32, hidden (1, B, H) f32)
    """
    x = dparams["embedding"][inp]                 # (B, E) bf16 gather (XLA)
    h = hidden[0]                                 # (B, H) f32

    B, E = x.shape
    H = h.shape[-1]
    assert B % 8 == 0, "batch must be a multiple of 8 (sublane)"
    n_tiles, _, tv = dparams["w_out_q"].shape
    v_pad = n_tiles * tv
    vmem_cap = _tpu_vmem_capacity_bytes()

    # ---- GRU step: tiny single-shot kernel producing h_new in f32 (recurrent
    #      state) and bf16 (projection operand). ----
    h_new_f32, h_new_bf16 = pl.pallas_call(
        _gru_kernel,
        out_shape=(
            jax.ShapeDtypeStruct((B, H), jnp.float32),
            jax.ShapeDtypeStruct((B, H), jnp.bfloat16),
        ),
        compiler_params=pltpu.CompilerParams(
            vmem_limit_bytes=_gru_vmem_limit(B, E, H, vmem_cap)),
    )(x, h, dparams["w_ih_t"], dparams["w_hh_t"],
      dparams["b_ih"], dparams["b_hh"])

    # ---- Output projection: vocab tiles are independent -> "parallel" grid
    #      (sharded across both TensorCores on v7x); int8 weights streamed as
    #      contiguous (H, tv) slabs with double-buffering. ----
    grid_spec = pltpu.PrefetchScalarGridSpec(
        num_scalar_prefetch=0,
        grid=(n_tiles,),
        in_specs=[
            pl.BlockSpec((B, H), lambda j: (0, 0)),          # h_new (tiny resident)
            pl.BlockSpec((1, H, tv), lambda j: (j, 0, 0)),   # w_out int8 (streamed)
            pl.BlockSpec((1, tv), lambda j: (0, j)),         # per-column scale
            pl.BlockSpec((1, tv), lambda j: (0, j)),         # bias
        ],
        out_specs=pl.BlockSpec((B, tv), lambda j: (0, j)),   # prediction tile
    )
    pred_pad = pl.pallas_call(
        _proj_kernel,
        out_shape=jax.ShapeDtypeStruct((B, v_pad), jnp.float32),
        grid_spec=grid_spec,
        compiler_params=pltpu.CompilerParams(
            dimension_semantics=("parallel",),
            vmem_limit_bytes=_proj_vmem_limit(B, H, tv, vmem_cap)),
    )(h_new_bf16, dparams["w_out_q"], dparams["w_out_scale"], dparams["b_out"])

    # Drop the vocab padding; hidden back to (1, B, H).
    return pred_pad[:, :output_vocab_dim], h_new_f32[None]


# ----------------------------------------------------------------------------
# Pure-JAX f32 reference (original, un-quantized params)
# ----------------------------------------------------------------------------

def _reference(inp, hidden, params):
    x = params["embedding"][inp]
    h = hidden[0]
    H = h.shape[-1]
    gi = x @ params["w_ih"].T + params["b_ih"]
    gh = h @ params["w_hh"].T + params["b_hh"]
    r = jax.nn.sigmoid(gi[:, :H] + gh[:, :H])
    z = jax.nn.sigmoid(gi[:, H:2 * H] + gh[:, H:2 * H])
    n = jnp.tanh(gi[:, 2 * H:] + r * gh[:, 2 * H:])
    h_new = (1.0 - z) * n + z * h
    pred = h_new @ params["w_out"].T + params["b_out"]
    return pred, h_new[None]


if __name__ == "__main__":
    # Small but hardware-aligned shapes: B multiple of 8, E/H multiples of 128.
    # V = 320 is deliberately NOT a multiple of 128 to exercise the padded
    # vocab tiling path (pads to 384 -> 3 tiles at tv=128).
    B, E, H, V = 8, 128, 128, 320
    key = jax.random.PRNGKey(0)
    k_param, k_inp, k_hid = jax.random.split(key, 3)

    params = init_params(k_param, E, H, V)
    inp = jax.random.randint(k_inp, (B,), 0, V, dtype=jnp.int32)      # token ids
    hidden = jax.random.normal(k_hid, (1, B, H), jnp.float32)         # (num_layers=1, B, H)

    # Force tv=128 so the test runs several vocab tiles through the parallel
    # grid (auto-sizing would pick a single tile at this tiny V).
    dparams = prepare_decode_params(params, tv=128, batch_hint=B)

    pred, h_new = decoder_base_forward(inp, hidden, dparams, output_vocab_dim=V)
    jax.block_until_ready((pred, h_new))

    ref_pred, ref_h = _reference(inp, hidden, params)
    assert pred.shape == (B, V) and h_new.shape == (1, B, H)
    # bf16 operands + int8 per-column-scaled output weights in the kernel ->
    # loosened tolerances vs the pure-f32 reference.
    assert jnp.allclose(pred, ref_pred, atol=5e-2, rtol=5e-2), \
        float(jnp.max(jnp.abs(pred - ref_pred)))
    assert jnp.allclose(h_new, ref_h, atol=5e-2, rtol=5e-2), \
        float(jnp.max(jnp.abs(h_new - ref_h)))

    print("KERNEL_OK")
</pallas_src>

<mosaic_0001>
module attributes {stable_mosaic.version = 11 : i64} {
  func.func @_gru_kernel(%arg0: memref<8x128xbf16, #tpu.memory_space<vmem>>, %arg1: memref<8x128xf32, #tpu.memory_space<vmem>>, %arg2: memref<128x384xbf16, #tpu.memory_space<vmem>>, %arg3: memref<128x384xbf16, #tpu.memory_space<vmem>>, %arg4: memref<1x384xf32, #tpu.memory_space<vmem>>, %arg5: memref<1x384xf32, #tpu.memory_space<vmem>>, %arg6: memref<8x128xf32, #tpu.memory_space<vmem>>, %arg7: memref<8x128xbf16, #tpu.memory_space<vmem>>) attributes {dimension_semantics = [], scalar_prefetch = 0 : i64, scratch_operands = 0 : i64, tpu.core_type = #tpu.core_type<tc>} {
    %c0 = arith.constant 0 : index
    %c0_0 = arith.constant 0 : index
    %0 = vector.load %arg0[%c0, %c0_0] : memref<8x128xbf16, #tpu.memory_space<vmem>>, vector<8x128xbf16>
    %c0_1 = arith.constant 0 : index
    %c0_2 = arith.constant 0 : index
    %1 = vector.load %arg1[%c0_1, %c0_2] : memref<8x128xf32, #tpu.memory_space<vmem>>, vector<8x128xf32>
    %c0_3 = arith.constant 0 : index
    %c0_4 = arith.constant 0 : index
    %2 = vector.load %arg2[%c0_3, %c0_4] : memref<128x384xbf16, #tpu.memory_space<vmem>>, vector<128x384xbf16>
    %cst = arith.constant dense<0.000000e+00> : vector<8x384xf32>
    %3 = tpu.matmul %0, %2, %cst {dimension_numbers = #tpu.dot_dimension_numbers<[1], [0], [0], [1], [0, 0, 1, 1], [], []>} : vector<8x128xbf16>, vector<128x384xbf16>, vector<8x384xf32> -> vector<8x384xf32>
    %c0_5 = arith.constant 0 : index
    %c0_6 = arith.constant 0 : index
    %4 = vector.load %arg4[%c0_5, %c0_6] : memref<1x384xf32, #tpu.memory_space<vmem>>, vector<1x384xf32>
    %5 = vector.broadcast %4 : vector<1x384xf32> to vector<8x384xf32>
    %6 = arith.addf %3, %5 : vector<8x384xf32>
    %7 = arith.truncf %1 : vector<8x128xf32> to vector<8x128xbf16>
    %c0_7 = arith.constant 0 : index
    %c0_8 = arith.constant 0 : index
    %8 = vector.load %arg3[%c0_7, %c0_8] : memref<128x384xbf16, #tpu.memory_space<vmem>>, vector<128x384xbf16>
    %cst_9 = arith.constant dense<0.000000e+00> : vector<8x384xf32>
    %9 = tpu.matmul %7, %8, %cst_9 {dimension_numbers = #tpu.dot_dimension_numbers<[1], [0], [0], [1], [0, 0, 1, 1], [], []>} : vector<8x128xbf16>, vector<128x384xbf16>, vector<8x384xf32> -> vector<8x384xf32>
    %c0_10 = arith.constant 0 : index
    %c0_11 = arith.constant 0 : index
    %10 = vector.load %arg5[%c0_10, %c0_11] : memref<1x384xf32, #tpu.memory_space<vmem>>, vector<1x384xf32>
    %11 = vector.broadcast %10 : vector<1x384xf32> to vector<8x384xf32>
    %12 = arith.addf %9, %11 : vector<8x384xf32>
    %13 = vector.extract_strided_slice %6 {offsets = [0, 0], sizes = [8, 128], strides = [1, 1]} : vector<8x384xf32> to vector<8x128xf32>
    %14 = vector.extract_strided_slice %12 {offsets = [0, 0], sizes = [8, 128], strides = [1, 1]} : vector<8x384xf32> to vector<8x128xf32>
    %15 = arith.addf %13, %14 : vector<8x128xf32>
    %16 = arith.negf %15 : vector<8x128xf32>
    %17 = math.exp %16 : vector<8x128xf32>
    %cst_12 = arith.constant 1.000000e+00 : f32
    %18 = vector.broadcast %cst_12 : f32 to vector<8x128xf32>
    %19 = arith.addf %18, %17 : vector<8x128xf32>
    %20 = arith.divf %18, %19 : vector<8x128xf32>
    %21 = vector.extract_strided_slice %6 {offsets = [0, 128], sizes = [8, 128], strides = [1, 1]} : vector<8x384xf32> to vector<8x128xf32>
    %22 = vector.extract_strided_slice %12 {offsets = [0, 128], sizes = [8, 128], strides = [1, 1]} : vector<8x384xf32> to vector<8x128xf32>
    %23 = arith.addf %21, %22 : vector<8x128xf32>
    %24 = arith.negf %23 : vector<8x128xf32>
    %25 = math.exp %24 : vector<8x128xf32>
    %cst_13 = arith.constant 1.000000e+00 : f32
    %26 = vector.broadcast %cst_13 : f32 to vector<8x128xf32>
    %27 = arith.addf %26, %25 : vector<8x128xf32>
    %28 = arith.divf %26, %27 : vector<8x128xf32>
    %29 = vector.extract_strided_slice %6 {offsets = [0, 256], sizes = [8, 128], strides = [1, 1]} : vector<8x384xf32> to vector<8x128xf32>
    %30 = vector.extract_strided_slice %12 {offsets = [0, 256], sizes = [8, 128], strides = [1, 1]} : vector<8x384xf32> to vector<8x128xf32>
    %31 = arith.mulf %20, %30 : vector<8x128xf32>
    %32 = arith.addf %29, %31 : vector<8x128xf32>
    %33 = math.tanh %32 : vector<8x128xf32>
    %cst_14 = arith.constant 1.000000e+00 : f32
    %34 = vector.broadcast %cst_14 : f32 to vector<8x128xf32>
    %35 = arith.subf %34, %28 : vector<8x128xf32>
    %36 = arith.mulf %35, %33 : vector<8x128xf32>
    %37 = arith.mulf %28, %1 : vector<8x128xf32>
    %38 = arith.addf %36, %37 : vector<8x128xf32>
    %c0_15 = arith.constant 0 : index
    %c0_16 = arith.constant 0 : index
    %39 = vector.load %arg6[%c0_15, %c0_16] : memref<8x128xf32, #tpu.memory_space<vmem>>, vector<8x128xf32>
    tpu.vector_store %arg6[%c0_15, %c0_16], %38 {strides = array<i32>} : memref<8x128xf32, #tpu.memory_space<vmem>>, vector<8x128xf32>,
    %40 = arith.truncf %38 : vector<8x128xf32> to vector<8x128xbf16>
    %c0_17 = arith.constant 0 : index
    %c0_18 = arith.constant 0 : index
    %41 = vector.load %arg7[%c0_17, %c0_18] : memref<8x128xbf16, #tpu.memory_space<vmem>>, vector<8x128xbf16>
    tpu.vector_store %arg7[%c0_17, %c0_18], %40 {strides = array<i32>} : memref<8x128xbf16, #tpu.memory_space<vmem>>, vector<8x128xbf16>,
    return
  }
}

module attributes {stable_mosaic.version = 11 : i64} {
  func.func @_proj_kernel(%arg0: i32, %arg1: memref<8x128xbf16, #tpu.memory_space<vmem>>, %arg2: memref<1x128x128xi8, #tpu.memory_space<vmem>>, %arg3: memref<1x128xf32, #tpu.memory_space<vmem>>, %arg4: memref<1x128xf32, #tpu.memory_space<vmem>>, %arg5: memref<8x128xf32, #tpu.memory_space<vmem>>) attributes {dimension_semantics = [#tpu.dimension_semantics<parallel>], iteration_bounds = array<i64: 3>, scalar_prefetch = 0 : i64, scratch_operands = 0 : i64, tpu.core_type = #tpu.core_type<tc>, window_params = [{pipeline_mode = #tpu.pipeline_mode<synchronous>, transform_indices = @transform_0, window_bounds = array<i64: 8, 128>}, {transform_indices = @transform_1, window_bounds = array<i64: 1, 128, 128>}, {transform_indices = @transform_2, window_bounds = array<i64: 1, 128>}, {transform_indices = @transform_3, window_bounds = array<i64: 1, 128>}, {transform_indices = @transform_4, window_bounds = array<i64: 8, 128>}]} {
    %c0 = arith.constant 0 : index
    %c0_0 = arith.constant 0 : index
    %c0_1 = arith.constant 0 : index
    %0 = vector.load %arg2[%c0, %c0_0, %c0_1] : memref<1x128x128xi8, #tpu.memory_space<vmem>>, vector<1x128x128xi8>
    %1 = vector.shape_cast %0 : vector<1x128x128xi8> to vector<128x128xi8>
    %2 = arith.sitofp %1 : vector<128x128xi8> to vector<128x128xbf16>
    %c0_2 = arith.constant 0 : index
    %c0_3 = arith.constant 0 : index
    %3 = vector.load %arg1[%c0_2, %c0_3] : memref<8x128xbf16, #tpu.memory_space<vmem>>, vector<8x128xbf16>
    %cst = arith.constant dense<0.000000e+00> : vector<8x128xf32>
    %4 = tpu.matmul %3, %2, %cst {dimension_numbers = #tpu.dot_dimension_numbers<[1], [0], [0], [1], [0, 0, 1, 1], [], []>} : vector<8x128xbf16>, vector<128x128xbf16>, vector<8x128xf32> -> vector<8x128xf32>
    %c0_4 = arith.constant 0 : index
    %c0_5 = arith.constant 0 : index
    %5 = vector.load %arg3[%c0_4, %c0_5] : memref<1x128xf32, #tpu.memory_space<vmem>>, vector<1x128xf32>
    %6 = vector.broadcast %5 : vector<1x128xf32> to vector<8x128xf32>
    %7 = arith.mulf %4, %6 : vector<8x128xf32>
    %c0_6 = arith.constant 0 : index
    %c0_7 = arith.constant 0 : index
    %8 = vector.load %arg4[%c0_6, %c0_7] : memref<1x128xf32, #tpu.memory_space<vmem>>, vector<1x128xf32>
    %9 = vector.broadcast %8 : vector<1x128xf32> to vector<8x128xf32>
    %10 = arith.addf %7, %9 : vector<8x128xf32>
    %c0_8 = arith.constant 0 : index
    %c0_9 = arith.constant 0 : index
    %11 = vector.load %arg5[%c0_8, %c0_9] : memref<8x128xf32, #tpu.memory_space<vmem>>, vector<8x128xf32>
    tpu.vector_store %arg5[%c0_8, %c0_9], %10 {strides = array<i32>} : memref<8x128xf32, #tpu.memory_space<vmem>>, vector<8x128xf32>,
    return
  }
  func.func @transform_0(%arg0: i32) -> (i32, i32) {
    %c0_i32 = arith.constant 0 : i32
    %c0_i32_0 = arith.constant 0 : i32
    %c0_i32_1 = arith.constant 0 : i32
    return %c0_i32, %c0_i32_0 : i32, i32
  }
  func.func @transform_1(%arg0: i32) -> (i32, i32, i32) {
    %c0_i32 = arith.constant 0 : i32
    %c0_i32_0 = arith.constant 0 : i32
    %c0_i32_1 = arith.constant 0 : i32
    return %arg0, %c0_i32, %c0_i32_0 : i32, i32, i32
  }
  func.func @transform_2(%arg0: i32) -> (i32, i32) {
    %c0_i32 = arith.constant 0 : i32
    %c0_i32_0 = arith.constant 0 : i32
    return %c0_i32, %arg0 : i32, i32
  }
  func.func @transform_3(%arg0: i32) -> (i32, i32) {
    %c0_i32 = arith.constant 0 : i32
    %c0_i32_0 = arith.constant 0 : i32
    return %c0_i32, %arg0 : i32, i32
  }
  func.func @transform_4(%arg0: i32) -> (i32, i32) {
    %c0_i32 = arith.constant 0 : i32
    %c0_i32_0 = arith.constant 0 : i32
    return %c0_i32, %arg0 : i32, i32
  }
}

</mosaic_0001>

<bundles_post_ra>
// kernel: decoder_base_forward.2
= control target key start
LH: loop header
LB: loop body
LE: loop exit
PB: predicated region body
PF: predicated region fallthrough
CT: control target
= control target key end

     0   :  { %13 = vsyncpa [#allocation3], 0  ;;  %s1014_s0 = inlined_call_operand.vmem [shape: bf16[8,128], index: 0, kind: input, shape index: {}]   ;;  %s1015_s1 = inlined_call_operand.vmem [shape: f32[8,128], index: 1, kind: input, shape index: {}]   ;;  %s1016_s2 = inlined_call_operand.hbm [shape: bf16[128,384], index: 2, kind: input, shape index: {}]   ;;  %s1017_s3 = inlined_call_operand.hbm [shape: bf16[128,384], index: 3, kind: input, shape index: {}]   ;;  %s1018_s4 = inlined_call_operand.vmem [shape: f32[1,384], index: 4, kind: input, shape index: {}]   ;;  %s1019_s5 = inlined_call_operand.vmem [shape: f32[1,384], index: 5, kind: input, shape index: {}]   ;;  %s1020_s6 = inlined_call_operand.hbm [shape: f32[8,128], index: 6, kind: output, shape index: {0}]   ;;  %s1021_s7 = inlined_call_operand.vmem [shape: bf16[8,128], index: 7, kind: output, shape index: {1}]  }
   0x1   :  { %14 = vsyncpa [#allocation6], 0 }
   0x2   :  { %15 = vsyncpa [#allocation4], 0  ;;  %s888_s24 = smov [#allocation2]   ;;  %s816_s28 = scalar_lea.hbm %s1016_s2, 3072 }
   0x3   :  { %s25_s25 = sshll.u32 %s888_s24, 4  ;;  %p817_p0 = scmp.ne.s32.totalorder %s1016_s2, %s816_s28  ;;  %s26_s25 = int_to_ptr.vmem [resolvable:$true] %s25_s25 }
   0x4   :  { %p820_p1 = scmp.lt.u32.totalorder %s816_s28, %s1016_s2 }
   0x6   :  { %p822_p2 = pnand %p820_p1, %p817_p0 }
   0x8   :  { %825 = shalt.err (!%p822_p2)
}
   0x9   :  { %s826_s10 = scalar_lea.vmem %s26_s25, 3072  ;;  %p831_p4 = scmp.lt.s32.totalorder %s26_s25, %s26_s25 }
   0xa   :  { %p827_p3 = scmp.ne.s32.totalorder %s26_s25, %s826_s10  ;;  %p832_p5 = scmp.lt.s32.totalorder %s826_s10, %s826_s10 }
   0xc   :  { %p833_p6 = por %p832_p5, %p831_p4 }
   0xe   :  { %p834_p7 = pnand %p833_p6, %p827_p3 }
  0x10   :  { %837 = shalt.err (!%p834_p7)
}
  0x11   :  { %s889_s11 = smov 192   ;;  %s890_s12 = smov 12  }
  0x12   :  { %31 = dma.hbm_to_vmem [thread:$0]  %s1016_s2, 3072, %s26_s25, [#allocation3], %s889_s11, %s889_s11, %s890_s12  }
  0x13   :  { %s891_s15 = smov [#allocation5]   ;;  %s838_s19 = scalar_lea.hbm %s1017_s3, 3072 }
  0x14   :  { %s37_s16 = sshll.u32 %s891_s15, 4  ;;  %p839_p8 = scmp.ne.s32.totalorder %s1017_s3, %s838_s19  ;;  %s38_s16 = int_to_ptr.vmem [resolvable:$true] %s37_s16 }
  0x15   :  { %p842_p9 = scmp.lt.u32.totalorder %s838_s19, %s1017_s3 }
  0x17   :  { %p844_p10 = pnand %p842_p9, %p839_p8 }
  0x19   :  { %847 = shalt.err (!%p844_p10)
}
  0x1a   :  { %s848_s24 = scalar_lea.vmem %s38_s16, 3072  ;;  %p853_p12 = scmp.lt.s32.totalorder %s38_s16, %s38_s16 }
  0x1b   :  { %p849_p11 = scmp.ne.s32.totalorder %s38_s16, %s848_s24  ;;  %p854_p13 = scmp.lt.s32.totalorder %s848_s24, %s848_s24 }
  0x1d   :  { %p855_p0 = por %p854_p13, %p853_p12 }
  0x1f   :  { %p856_p1 = pnand %p855_p0, %p849_p11 }
  0x21   :  { %859 = shalt.err (!%p856_p1)
}
  0x22   :  { %43 = dma.hbm_to_vmem [thread:$0]  %s1017_s3, 3072, %s38_s16, [#allocation6], %s889_s11, %s889_s11, %s890_s12  }
  0x23   :  { %882 = dma.done.wait [#allocation3], 3072  }
  0x24   :  { %883 = vsyncadd [#allocation3], 4294964224 }
  0x25   :  { %884 = dma.done.wait [#allocation6], 3072  }
  0x26   :  { %885 = vsyncadd [#allocation6], 4294964224  ;;  %v892_v0 = vmov 0.0   ;;  %v893_v1 = vmov 0   ;;  %vm894_vm0 = vmmov 0   ;;  %v985_v48 = vld [vmem:[%s1015_s1] sm:$0xff]  ;;  %v91_v57 = vlaneseq }
  0x27   :  { %686 = vmatprep.subr.bf16.mxu1 %v892_v0  ;;  %266 = vmatprep.mubr.bf16.mxu0 %v893_v1  ;;  %v742_v2 = vld [vmem:[#allocation2 + $0x4] ss:$12 sps:$4 sm:$0xff]   ;;  %v744_v3 = vld [vmem:[#allocation2] ss:$12 sps:$4 sm:$0xff]   ;;  %v745_v4 = vld [vmem:[#allocation2 + $0x1c] ss:$12 sps:$4 sm:$0xff]   ;;  %v315_v50 = vpack.c.bf16 %v985_v48, %v985_v48 }
  0x28   :  { %702 = vmatprep.mubr.msk.bf16.mxu1 %vm894_vm0, %v892_v0  ;;  %234 = vmatprep.subr.bf16.mxu0 %v742_v2  ;;  %v747_v5 = vld [vmem:[#allocation2 + $0x18] ss:$12 sps:$4 sm:$0xff]   ;;  %v748_v6 = vld [vmem:[#allocation2 + $0x34] ss:$12 sps:$4 sm:$0xff]   ;;  %v750_v7 = vld [vmem:[#allocation2 + $0x30] ss:$12 sps:$4 sm:$0xff]  }
  0x29   :  { %235 = vmatpush1.bf16.msra.mxu0 %v744_v3  ;;  %v751_v8 = vld [vmem:[#allocation2 + $0x4c] ss:$12 sps:$4 sm:$0xff]   ;;  %v762_v9 = vld [vmem:[#allocation2 + $0x8] ss:$12 sps:$4 sm:$0xff]   ;;  %v754_v11 = vld [vmem:[#allocation2 + $0x64] ss:$12 sps:$4 sm:$0xff]  }
  0x2a   :  { %236 = vmatprep.subr.bf16.mxu0 %v745_v4  ;;  %v753_v10 = vld [vmem:[#allocation2 + $0x48] ss:$12 sps:$4 sm:$0xff]   ;;  %687 = vmatpush3.bf16.msra.mxu1 %v762_v9  ;;  %v766_v12 = vld [vmem:[#allocation2 + $0x20] ss:$12 sps:$4 sm:$0xff]   ;;  %v768_v14 = vld [vmem:[#allocation2 + $0x38] ss:$12 sps:$4 sm:$0xff]  }
  0x2b   :  { %688 = vmatprep.subr.bf16.mxu1 %v892_v0  ;;  %v756_v13 = vld [vmem:[#allocation2 + $0x60] ss:$12 sps:$4 sm:$0xff]   ;;  %v757_v15 = vld [vmem:[#allocation2 + $0x7c] ss:$12 sps:$4 sm:$0xff]   ;;  %v759_v16 = vld [vmem:[#allocation2 + $0x78] ss:$12 sps:$4 sm:$0xff]  }
  0x2c   :  { %v772_v17 = vld [vmem:[#allocation2 + $0x50] ss:$12 sps:$4 sm:$0xff]   ;;  %v760_v18 = vld [vmem:[#allocation2 + $0x94] ss:$12 sps:$4 sm:$0xff]   ;;  %v764_v21 = vld [vmem:[#allocation2 + $0xac] ss:$12 sps:$4 sm:$0xff]  }
  0x2d   :  { %237 = vmatpush1.bf16.msra.mxu0 %v747_v5  ;;  %v763_v19 = vld [vmem:[#allocation2 + $0x90] ss:$12 sps:$4 sm:$0xff]   ;;  %v776_v20 = vld [vmem:[#allocation2 + $0x68] ss:$12 sps:$4 sm:$0xff]   ;;  %v780_v23 = vld [vmem:[#allocation2 + $0x80] ss:$12 sps:$4 sm:$0xff]  }
  0x2e   :  { %238 = vmatprep.subr.bf16.mxu0 %v748_v6  ;;  %689 = vmatpush3.bf16.msra.mxu1 %v766_v12  ;;  %v767_v22 = vld [vmem:[#allocation2 + $0xa8] ss:$12 sps:$4 sm:$0xff]   ;;  %v771_v24 = vld [vmem:[#allocation5 + $0x4] ss:$12 sps:$4 sm:$0xff]   ;;  %v769_v25 = vld [vmem:[#allocation5] ss:$12 sps:$4 sm:$0xff]  }
  0x2f   :  { %690 = vmatprep.subr.bf16.mxu1 %v892_v0  ;;  %v55_v26 = vld [vmem:[%s1014_s0] sm:$0xf]  ;;  %v784_v27 = vld [vmem:[#allocation2 + $0x98] ss:$12 sps:$4 sm:$0xff]   ;;  %v775_v28 = vld [vmem:[#allocation5 + $0x1c] ss:$12 sps:$4 sm:$0xff]  }
  0x30   :  { %v773_v29 = vld [vmem:[#allocation5 + $0x18] ss:$12 sps:$4 sm:$0xff]   ;;  %v788_v30 = vld [vmem:[#allocation2 + $0xb0] ss:$12 sps:$4 sm:$0xff]   ;;  %v779_v31 = vld [vmem:[#allocation5 + $0x34] ss:$12 sps:$4 sm:$0xff]  }
  0x31   :  { %239 = vmatpush1.bf16.msra.mxu0 %v750_v7  ;;  %v777_v32 = vld [vmem:[#allocation5 + $0x30] ss:$12 sps:$4 sm:$0xff]   ;;  %v795_v33 = vld [vmem:[#allocation5 + $0x8] ss:$12 sps:$4 sm:$0xff]   ;;  %v783_v34 = vld [vmem:[#allocation5 + $0x4c] ss:$12 sps:$4 sm:$0xff]  }
  0x32   :  { %240 = vmatprep.subr.bf16.mxu0 %v751_v8  ;;  %691 = vmatpush3.bf16.msra.mxu1 %v768_v14  ;;  %v781_v35 = vld [vmem:[#allocation5 + $0x48] ss:$12 sps:$4 sm:$0xff]   ;;  %v799_v36 = vld [vmem:[#allocation5 + $0x20] ss:$12 sps:$4 sm:$0xff]   ;;  %v787_v37 = vld [vmem:[#allocation5 + $0x64] ss:$12 sps:$4 sm:$0xff]  }
  0x33   :  { %692 = vmatprep.subr.bf16.mxu1 %v892_v0  ;;  %v785_v38 = vld [vmem:[#allocation5 + $0x60] ss:$12 sps:$4 sm:$0xff]   ;;  %v800_v39 = vld [vmem:[#allocation5 + $0x38] ss:$12 sps:$4 sm:$0xff]   ;;  %v791_v40 = vld [vmem:[#allocation5 + $0x7c] ss:$12 sps:$4 sm:$0xff]  }
  0x34   :  { %v789_v41 = vld [vmem:[#allocation5 + $0x78] ss:$12 sps:$4 sm:$0xff]   ;;  %v801_v42 = vld [vmem:[#allocation5 + $0x50] ss:$12 sps:$4 sm:$0xff]   ;;  %v794_v43 = vld [vmem:[#allocation5 + $0x94] ss:$12 sps:$4 sm:$0xff]  }
  0x35   :  { %241 = vmatpush1.bf16.msra.mxu0 %v753_v10  ;;  %v792_v44 = vld [vmem:[#allocation5 + $0x90] ss:$12 sps:$4 sm:$0xff]   ;;  %v802_v45 = vld [vmem:[#allocation5 + $0x68] ss:$12 sps:$4 sm:$0xff]   ;;  %v798_v46 = vld [vmem:[#allocation5 + $0xac] ss:$12 sps:$4 sm:$0xff]  }
  0x36   :  { %242 = vmatprep.subr.bf16.mxu0 %v754_v11  ;;  %693 = vmatpush3.bf16.msra.mxu1 %v772_v17  ;;  %v796_v47 = vld [vmem:[#allocation5 + $0xa8] ss:$12 sps:$4 sm:$0xff]   ;;  %v803_v49 = vld [vmem:[#allocation5 + $0x80] ss:$12 sps:$4 sm:$0xff]   ;;  %v804_v51 = vld [vmem:[#allocation5 + $0x98] ss:$12 sps:$4 sm:$0xff]  }
  0x37   :  { %694 = vmatprep.subr.bf16.mxu1 %v892_v0  ;;  %v805_v52 = vld [vmem:[#allocation5 + $0xb0] ss:$12 sps:$4 sm:$0xff]   ;;  %v92_v58 = vshrl.u32 %v91_v57, 7  ;;  %v348_v60 = vld [vmem:[%s1019_s5] sm:$0x7] }
  0x38   :  { %v89_v61 = vld [vmem:[%s1018_s4] sm:$0x7]  ;;  %s895_s4 = smov [#allocation7]  }
  0x39   :  { %243 = vmatpush1.bf16.msra.mxu0 %v756_v13  ;;  %v93_v59 = vsub.s32 0, %v92_v58  ;;  %v97_v62 = vsub.s32 1, %v92_v58  ;;  %s604_s5 = sshll.u32 %s895_s4, 4  ;;  %s605_s5 = int_to_ptr.vmem [resolvable:$true] %s604_s5 }
  0x3a   :  { %244 = vmatprep.subr.bf16.mxu0 %v757_v15  ;;  %695 = vmatpush3.bf16.msra.mxu1 %v776_v20  ;;  %s860_s8 = scalar_lea.vmem %s605_s5, 128  ;;  %p865_p3 = scmp.lt.s32.totalorder %s605_s5, %s605_s5 }
  0x3b   :  { %696 = vmatprep.subr.bf16.mxu1 %v892_v0  ;;  %v94_v63 = vrot.slane %v89_v61, %v93_v59  ;;  %v357_v2 = vrot.slane %v348_v60, %v97_v62  ;;  %p861_p2 = scmp.ne.s32.totalorder %s605_s5, %s860_s8  ;;  %p866_p4 = scmp.lt.s32.totalorder %s860_s8, %s860_s8 }
  0x3d   :  { %245 = vmatpush1.bf16.msra.mxu0 %v759_v16  ;;  %p867_p5 = por %p866_p4, %p865_p3 }
  0x3e   :  { %246 = vmatprep.subr.bf16.mxu0 %v760_v18  ;;  %697 = vmatpush3.bf16.msra.mxu1 %v780_v23 }
  0x3f   :  { %698 = vmatprep.subr.bf16.mxu1 %v892_v0  ;;  %p868_p6 = pnand %p867_p5, %p861_p2 }
  0x41   :  { %247 = vmatpush1.bf16.msra.mxu0 %v763_v19  ;;  %v101_v19 = vsub.s32 2, %v92_v58 }
  0x42   :  { %248 = vmatprep.subr.bf16.mxu0 %v764_v21  ;;  %699 = vmatpush3.bf16.msra.mxu1 %v784_v27 }
  0x43   :  { %700 = vmatprep.subr.bf16.mxu1 %v892_v0  ;;  %v361_v20 = vrot.slane %v348_v60, %v101_v19 }
  0x45   :  { %249 = vmatpush1.bf16.msra.mxu0 %v767_v22  ;;  %v102_v22 = vrot.slane %v89_v61, %v101_v19 }
  0x46   :  { %493 = vmatprep.subr.bf16.mxu0 %v771_v24  ;;  %701 = vmatpush3.bf16.msra.mxu1 %v788_v30 }
  0x47   :  { %706 = vmatprep.subr.bf16.mxu1 %v892_v0 }
  0x48   :  { %267 = vmatmul.mubr.bf16.vlgmr.msra.gmra.mrb[0].mxu0 %v55_v26 }
  0x49   :  { %494 = vmatpush1.bf16.msra.mxu0 %v769_v25  ;;  %525 = vmatprep.mubr.bf16.mxu0 %v893_v1  ;;  %v98_v1 = vrot.slane %v89_v61, %v97_v62 }
  0x4a   :  { %495 = vmatprep.subr.bf16.mxu0 %v775_v28  ;;  %703 = vmatmul.mubr.bf16.vlgmr.msra.gmra.mrb[0].mxu1 %v55_v26 }
  0x4b   :  { %707 = vmatpush3.bf16.msra.mxu1 %v795_v33  ;;  %722 = vmatprep.mubr.msk.bf16.mxu1 %vm894_vm0, %v892_v0  ;;  %v728_v5 = vadd.f32 %v357_v2, %v98_v1 }
  0x4c   :  { %708 = vmatprep.subr.bf16.mxu1 %v892_v0 }
  0x4d   :  { %496 = vmatpush1.bf16.msra.mxu0 %v773_v29 }
  0x4e   :  { %497 = vmatprep.subr.bf16.mxu0 %v779_v31 }
  0x4f   :  { %709 = vmatpush3.bf16.msra.mxu1 %v799_v36 }
  0x50   :  { %710 = vmatprep.subr.bf16.mxu1 %v892_v0 }
  0x51   :  { %498 = vmatpush1.bf16.msra.mxu0 %v777_v32 }
  0x52   :  { %499 = vmatprep.subr.bf16.mxu0 %v783_v34 }
  0x53   :  { %711 = vmatpush3.bf16.msra.mxu1 %v800_v39 }
  0x54   :  { %712 = vmatprep.subr.bf16.mxu1 %v892_v0 }
  0x55   :  { %500 = vmatpush1.bf16.msra.mxu0 %v781_v35 }
  0x56   :  { %501 = vmatprep.subr.bf16.mxu0 %v787_v37 }
  0x57   :  { %713 = vmatpush3.bf16.msra.mxu1 %v801_v42 }
  0x58   :  { %714 = vmatprep.subr.bf16.mxu1 %v892_v0 }
  0x59   :  { %502 = vmatpush1.bf16.msra.mxu0 %v785_v38 }
  0x5a   :  { %503 = vmatprep.subr.bf16.mxu0 %v791_v40 }
  0x5b   :  { %715 = vmatpush3.bf16.msra.mxu1 %v802_v45 }
  0x5c   :  { %716 = vmatprep.subr.bf16.mxu1 %v892_v0 }
  0x5d   :  { %504 = vmatpush1.bf16.msra.mxu0 %v789_v41 }
  0x5e   :  { %505 = vmatprep.subr.bf16.mxu0 %v794_v43 }
  0x5f   :  { %717 = vmatpush3.bf16.msra.mxu1 %v803_v49 }
  0x60   :  { %718 = vmatprep.subr.bf16.mxu1 %v892_v0 }
  0x61   :  { %506 = vmatpush1.bf16.msra.mxu0 %v792_v44 }
  0x62   :  { %507 = vmatprep.subr.bf16.mxu0 %v798_v46 }
  0x63   :  { %719 = vmatpush3.bf16.msra.mxu1 %v804_v51 }
  0x64   :  { %720 = vmatprep.subr.bf16.mxu1 %v892_v0  ;;  %v353_v0 = vrot.slane %v348_v60, %v93_v59 }
  0x65   :  { %508 = vmatpush1.bf16.msra.mxu0 %v796_v47 }
  0x66   :  { %v726_v3 = vadd.f32 %v353_v0, %v94_v63 }
  0x67   :  { %721 = vmatpush3.bf16.msra.mxu1 %v805_v52 }
  0x68   :  { %526 = vmatmul.mubr.bf16.vlgmr.msra.gmra.mrb[0].mxu0 %v315_v50 }
  0x6a   :  { %723 = vmatmul.mubr.bf16.vlgmr.msra.gmra.mrb[4].mxu1 %v315_v50 }
 0x11d   :  { %v309_v53 = vpop.f32.mrb[0].mxu1 }
 0x11e   :  { %v704_v54 = vpop.f32.mrb[1].mxu1  ;;  %v310_v26 = vadd.f32 %v309_v53, %v102_v22 }
 0x11f   :  { %v312_v55 = vpop.f32.mrb[2].mxu1 }
 0x120   :  { %v705_v56 = vpop.f32.mrb[3].mxu1 }
 0x13b   :  { %v527_v4 = vpop.f32.mrb[0].mxu0 }
 0x13c   :  { %v727_v6 = vadd.f32 %v726_v3, %v527_v4  ;;  %v529_v7 = vpop.f32.mrb[1].mxu0 }
 0x13d   :  { %v531_v8 = vpop.f32.mrb[2].mxu0  ;;  %v729_v11 = vadd.f32 %v728_v5, %v529_v7  ;;  %v568_v13 = vpop.f32.mrb[4].mxu1 }
 0x13e   :  { %v666_v9 = vmul.f32 -1.442695, %v727_v6  ;;  %v532_v10 = vpop.f32.mrb[3].mxu0  ;;  %v724_v14 = vpop.f32.mrb[5].mxu1  ;;  %v569_v24 = vadd.f32 %v568_v13, %v361_v20 }
 0x13f   :  { %v667_v12 = vmul.f32 -1.442695, %v729_v11  ;;  %v571_v15 = vpop.f32.mrb[6].mxu1 }
 0x140   :  { %806 = vpow2.f32 %v666_v9  ;;  %v725_v16 = vpop.f32.mrb[7].mxu1 }
 0x141   :  { %808 = vpow2.f32 %v667_v12 }
 0x14a   :  { %v807_v17 = vpop.eup %806 }
 0x14b   :  { %v578_v18 = vadd.f32 1.0, %v807_v17  ;;  %v809_v21 = vpop.eup %808 }
 0x14c   :  { %v585_v23 = vadd.f32 1.0, %v809_v21 }
 0x14d   :  { %810 = vrcp.f32 %v578_v18 }
 0x14e   :  { %812 = vrcp.f32 %v585_v23 }
 0x157   :  { %v811_v25 = vpop.eup %810 }
 0x158   :  { %v588_v27 = vmul.f32 %v811_v25, %v569_v24  ;;  %v813_v29 = vpop.eup %812 }
 0x159   :  { %v591_v30 = vsub.f32 1.0, %v813_v29  ;;  %v593_v33 = vmul.f32 %v813_v29, %v985_v48 }
 0x15a   :  { %v589_v28 = vadd.f32 %v588_v27, %v310_v26 }
 0x15c   :  { %814 = vtanh.f32 %v589_v28 }
 0x166   :  { %v815_v31 = vpop.eup %814 }
 0x167   :  { %v592_v32 = vmul.f32 %v815_v31, %v591_v30 }
 0x169   :  { %v594_v34 = vadd.f32 %v593_v33, %v592_v32 }
 0x16b   :  { %595 = vst [vmem:[#allocation7] sm:$0xff] %v594_v34  ;;  %v596_v35 = vpack.c.bf16 %v594_v34, %v594_v34 }
 0x16c   :  { %871 = shalt.err (!%p868_p6)
}
 0x16d   :  { %s872_s11 = scalar_lea.hbm %s1020_s6, 128 }
 0x16e   :  { %p873_p7 = scmp.ne.s32.totalorder %s1020_s6, %s872_s11  ;;  %p876_p8 = scmp.lt.u32.totalorder %s872_s11, %s1020_s6 }
 0x170   :  { %p878_p9 = pnand %p876_p8, %p873_p7 }
 0x172   :  { %881 = shalt.err (!%p878_p9)
}
 0x173   :  { %607 = dma.vmem_to_hbm [thread:$0]  %s605_s5, 128, %s1020_s6, [#allocation4]   ;;  %597 = vst [vmem:[%s1021_s7] sm:$0xf] %v596_v35 }
 0x174   :  { %886 = dma.done.wait [#allocation4], 128  }
 0x175   :  { %887 = vsyncadd [#allocation4], 4294967168 }
 0x176   :  { %615 = vsyncpa [#allocation3], 1 }
 0x177   :  { %616 = vsyncpa [#allocation6], 1 }
 0x178   :  { %617 = vsyncpa [#allocation4], 1 }

// kernel: decoder_base_forward.3
= control target key start
LH: loop header
LB: loop body
LE: loop exit
PB: predicated region body
PF: predicated region fallthrough
CT: control target
= control target key end

     0   :  { %9 = vsyncpa [#allocation3], 0  ;;  %s676_s0 = inlined_call_operand.vmem [shape: bf16[8,128], index: 0, kind: input, shape index: {}]   ;;  %s677_s1 = inlined_call_operand.vmem [shape: s8[3,128,128], index: 1, kind: input, shape index: {}]   ;;  %s678_s2 = inlined_call_operand.vmem [shape: f32[1,384], index: 2, kind: input, shape index: {}]   ;;  %s679_s3 = inlined_call_operand.vmem [shape: f32[1,384], index: 3, kind: input, shape index: {}]   ;;  %s680_s4 = inlined_call_operand.hbm [shape: f32[8,384], index: 4, kind: output, shape index: {}]  }
   0x1   :  { %11 = vsyncpa [#allocation3 + $0x1], 0  ;;  %s562_s15 = smov 0   ;;  %s564_s16 = smov 0  }
   0x2   :  { %s566_s17 = smov 0   ;;  %s568_s18 = smov 0  }
   0x3 LB: > { %s583_s19 = sadd.s32 4294967295, %s532_s18   ;;  %s386_s20 = sadd.s32 4294967294, %s532_s18   ;;  %s532_s18 = sphi %s568_s18, %s686_s18   ;;  %s528_s17 = sphi %s566_s17, %s685_s17   ;;  %s524_s16 = sphi %s564_s16, %s684_s16   ;;  %s520_s15 = sphi %s562_s15, %s683_s15  }
   0x4   : > { %s587_s21 = sadd.s32 1, %s532_s18   ;;  %s123_s22 = sadd.s32 1, %s528_s17 }
   0x5   : > { %s120_s23 = ssub.s32 %s532_s18, %s587_s21  ;;  %p133_p0 = scmp.ne.s32.totalorder %s528_s17, %s524_s16 }
   0x6   : > { %p121_p1 = scmp.eq.s32.totalorder %s120_s23, 0  ;;  %p134_p2 = scmp.eq.s32.totalorder %s583_s19, 2 }
   0x7   : > { %p139_p3 = scmp.ne.s32.totalorder %s524_s16, %s520_s15  ;;  %p140_p4 = scmp.eq.s32.totalorder %s386_s20, 2 }
   0x8   : > { %s598_s24 = scalar_select %p121_p1, %s528_s17, %s123_s22  }
   0x9   : > { %p600_p5 = por %p134_p2, %p133_p0  ;;  %p604_p6 = por %p140_p4, %p139_p3 }
   0xa   : > { %p389_p7 = scmp.ge.s32.totalorder %s532_s18, 1  ;;  %p181_p8 = scmp.lt.s32.totalorder %s532_s18, 4 }
   0xc   : > { %p182_p9 = pnand %p389_p7, %p181_p8 }
   0xd   : > { %p213_p10 = scmp.lt.s32.totalorder (!%p182_p9), %s583_s19, 2  ;;  %v534_v0 = vmov (!%p182_p9), 0.0   ;;  %vm535_vm0 = vmmov (!%p182_p9), 0   ;;  %v237_v13 = vld [vmem:[%s676_s0] sm:$0xf] (!%p182_p9)  ;;  %s210_s8 = sand.u32 (!%p182_p9), 1, %s524_s16  }
   0xe   : > { %185 = sbr.rel (%p182_p9) target bundleno = 289 (0x121), region = 36  ;;  %409 = vmatprep.subr.bf16.mxu0 (!%p182_p9), %v534_v0  ;;  %425 = vmatprep.mubr.msk.bf16.mxu0 (!%p182_p9), %vm535_vm0, %v534_v0  ;;  %s390_s9 = sshll.u32 (!%p182_p9), %s210_s8, 3 }
   0xf   : > { %s396_s22 = sshll.u32 (!%p182_p9), %s583_s19, 7  ;;  %s212_s23 = scalar_lea.vmem (!%p182_p9), [#allocation2], %s390_s9 }
  0x10   : > { %s536_s6 = smov (!%p182_p9), [#allocation2]  }
  0x11   : > { %s474_s7 = sshll.u32 (!%p182_p9), %s536_s6, 4  ;;  %s475_s7 = int_to_ptr.vmem [resolvable:$false] %s474_s7 }
  0x12   : > { %s476_s9 = scalar_lea.vmem (!%p182_p9), %s475_s7, 256 }
  0x15   : > { %s612_s27 = scalar_select %p213_p10, %s583_s19, 2 }
  0x17   : > { %s399_s28 = sshll.u32 %s612_s27, 5  ;;  %s220_s12 = scalar_lea.vmem %s678_s2, %s612_s27 }
  0x18   : > { %s217_s5 = scalar_lea.vmem %s677_s1, %s399_s28  ;;  %s223_s20 = scalar_lea.vmem %s679_s3, %s612_s27  ;;  %v393_v14 = vld [vmem:[%s220_s12] ss:$0 sm:$0xff] }
  0x19   : > { %v225_v1 = vld [vmem:[%s217_s5] sm:$0xff]  ;;  %v226_v4 = vld [vmem:[%s217_s5 + $0x8] sm:$0xff]  ;;  %v227_v7 = vld [vmem:[%s217_s5 + $0x10] sm:$0xff]  ;;  %s309_s28 = sshll.u32 %s212_s23, 4  ;;  %s296_s27 = scalar_lea.sflag [#allocation3], %s210_s8  ;;  %s636_s28 = int_to_ptr.vmem [resolvable:$true] %s309_s28 }
  0x1a   : > { %v229_v2 = vunpack.c.l.s8.bf16 %v225_v1  ;;  %v230_v3 = vunpack.c.h.s8.bf16 %v225_v1  ;;  %v231_v5 = vunpack.c.l.s8.bf16 %v226_v4  ;;  %v232_v6 = vunpack.c.h.s8.bf16 %v226_v4  ;;  %v228_v10 = vld [vmem:[%s217_s5 + $0x18] sm:$0xff]  ;;  %v394_v16 = vld [vmem:[%s223_s20] ss:$0 sm:$0xff]  ;;  %s634_s5 = scalar_lea.hbm %s680_s4, %s396_s22  ;;  %s470_s19 = scalar_lea.vmem %s636_s28, 128 }
  0x1b   : > { %v233_v8 = vunpack.c.l.s8.bf16 %v227_v7  ;;  %v234_v9 = vunpack.c.h.s8.bf16 %v227_v7  ;;  %v235_v11 = vunpack.c.l.s8.bf16 %v228_v10  ;;  %v236_v12 = vunpack.c.h.s8.bf16 %v228_v10  ;;  %p471_p11 = scmp.ne.s32.totalorder %s636_s28, %s470_s19  ;;  %p477_p0 = scmp.lt.s32.totalorder %s636_s28, %s475_s7 }
  0x1c   : > { %410 = vmatpush3.bf16.msra.mxu0 %v229_v2  ;;  %p478_p1 = scmp.lt.s32.totalorder %s476_s9, %s470_s19 }
  0x1d   : > { %411 = vmatprep.subr.bf16.mxu0 %v534_v0  ;;  %p472_p12 = pnand %p471_p11, %p600_p5 }
  0x1e   : > { %p479_p2 = por %p478_p1, %p477_p0 }
  0x1f   : > { %p473_p13 = pneg %p472_p12 }
  0x20   : > { %412 = vmatpush3.bf16.msra.mxu0 %v230_v3 }
  0x21   : > { %413 = vmatprep.subr.bf16.mxu0 %v534_v0  ;;  %p480_p3 = pnand %p479_p2, %p473_p13 }
  0x24   : > { %414 = vmatpush3.bf16.msra.mxu0 %v231_v5 }
  0x25   : > { %415 = vmatprep.subr.bf16.mxu0 %v534_v0 }
  0x28   : > { %416 = vmatpush3.bf16.msra.mxu0 %v232_v6 }
  0x29   : > { %417 = vmatprep.subr.bf16.mxu0 %v534_v0 }
  0x2c   : > { %418 = vmatpush3.bf16.msra.mxu0 %v233_v8 }
  0x2d   : > { %419 = vmatprep.subr.bf16.mxu0 %v534_v0 }
  0x30   : > { %420 = vmatpush3.bf16.msra.mxu0 %v234_v9 }
  0x31   : > { %421 = vmatprep.subr.bf16.mxu0 %v534_v0 }
  0x34   : > { %422 = vmatpush3.bf16.msra.mxu0 %v235_v11 }
  0x35   : > { %423 = vmatprep.subr.bf16.mxu0 %v534_v0 }
  0x38   : > { %424 = vmatpush3.bf16.msra.mxu0 %v236_v12 }
  0x3b   : > { %426 = vmatmul.mubr.bf16.vlgmr.msra.gmra.mrb[0].mxu0 %v237_v13 }
 0x10e   : > { %v272_v15 = vpop.f32.mrb[0].mxu0 }
 0x10f   : > { %v285_v17 = vmul.f32 %v393_v14, %v272_v15  ;;  %v427_v18 = vpop.f32.mrb[1].mxu0 }
 0x110   : > { %v275_v19 = vpop.f32.mrb[2].mxu0 }
 0x111   : > { %v293_v20 = vadd.f32 %v394_v16, %v285_v17  ;;  %v428_v21 = vpop.f32.mrb[3].mxu0 }
 0x113   : > { %294 = vst [vmem:[%s212_s23] sm:$0xff] %v293_v20 }
 0x114   : > { %483 = shalt.err (!%p480_p3)
}
 0x115   : > { %s484_s8 = scalar_lea.hbm %s634_s5, 128  ;;  %s488_s12 = scalar_lea.hbm %s680_s4, 384 }
 0x116   : > { %p485_p4 = scmp.ne.s32.totalorder %s634_s5, %s484_s8  ;;  %p489_p9 = scmp.lt.u32.totalorder %s634_s5, %s680_s4 }
 0x117   : > { %p490_p10 = scmp.lt.u32.totalorder %s488_s12, %s484_s8  ;;  %p492_p12 = scmp.lt.u32.totalorder %s484_s8, %s634_s5 }
 0x118   : > { %p486_p7 = pnand %p485_p4, %p600_p5 }
 0x119   : > { %p491_p11 = por %p490_p10, %p489_p9 }
 0x11a   : > { %p487_p8 = pneg %p486_p7 }
 0x11b   : > { %p493_p13 = por %p492_p12, %p491_p11 }
 0x11d   : > { %p494_p0 = pnand %p493_p13, %p487_p8 }
 0x11f   : > { %497 = shalt.err (!%p494_p0)
}
 0x120   : > { %429 = dma.vmem_to_hbm [thread:$0]  (%p600_p5), %s636_s28, 128, %s634_s5, %s296_s27  }
 0x121 PF: > { %p435_p1 = scmp.ge.s32.totalorder %s532_s18, 2  ;;  %s321_s20 = sand.u32 1, %s520_s15  }
 0x122   : > { %s322_s22 = scalar_lea.sflag [#allocation3], %s321_s20 }
 0x123   : > { %p432_p2 = pnand %p435_p1, %p604_p6 }
 0x125   : > { %515 = dma.done.wait (!%p432_p2), %s322_s22, 128  }
 0x126   : > { %517 = vsyncadd (!%p432_p2), %s322_s22, 4294967168  ;;  %p14_p3 = scmp.ge.s32.totalorder %s587_s21, 5   ;;  %s683_s15 = smov %s524_s16 }
 0x127   : > { %s684_s16 = smov %s528_s17  ;;  %s685_s17 = smov %s598_s24 }
 0x128   : > { %s686_s18 = smov %s587_s21  ;;  %16 = sbr.rel (!%p14_p3) target bundleno = 3 (0x3), region = 77 }
 0x12f   :  { %327 = vsyncpa [#allocation3], 1 }
 0x130   :  { %329 = vsyncpa [#allocation3 + $0x1], 1 }

</bundles_post_ra>
